<compile_context>
chip_gen: v7x
topology: tpu7x:2x2x1
jax: 0.10.0
libtpu: 0.0.40
codegen_flags: <defaults>
</compile_context>

<pallas_src>
import jax
import jax.numpy as jnp
from jax.experimental import pallas as pl
from jax.experimental.pallas import tpu as pltpu

HIDDEN = 128


def ae_kernel(x_ref, w1_ref, b1_ref, w2_ref, b2_ref,
              w3_ref, b3_ref, w4_ref, b4_ref, o_ref):
    # Whole MLP hot path (4 matmuls + bias + ReLU) for one (tb, D) batch tile,
    # fully VMEM/vreg resident.  Matmul operand dtype follows the weights
    # (bf16 on v6e/v7x, f32 for exact semantics); accumulation is always f32.
    cdt = w1_ref.dtype

    h = jnp.dot(x_ref[...].astype(cdt), w1_ref[...],
                preferred_element_type=jnp.float32)
    h = jnp.maximum(h + b1_ref[...], 0.0)

    h = jnp.dot(h.astype(cdt), w2_ref[...], preferred_element_type=jnp.float32)
    h = jnp.maximum(h + b2_ref[...], 0.0)

    h = jnp.dot(h.astype(cdt), w3_ref[...], preferred_element_type=jnp.float32)
    h = jnp.maximum(h + b3_ref[...], 0.0)

    h = jnp.dot(h.astype(cdt), w4_ref[...], preferred_element_type=jnp.float32)
    o_ref[...] = jnp.maximum(h + b4_ref[...], 0.0).astype(o_ref.dtype)


def _round_up(x, m):
    return (x + m - 1) // m * m


def _pick_batch_tile(B):
    # Big tiles fill the 256-wide v6e/v7x MXU; keep >=2 grid steps when the
    # batch allows so the 'parallel' axis shards across v7x's two TensorCores.
    if B >= 512:
        return 256
    if B >= 256:
        return 128
    return _round_up(B, 8)  # small batch: single full tile


def ae_forward(x, params, *, tb=None, compute_dtype=jnp.bfloat16):
    """x: (B, D) float32.  params: (in,out) weights, (1,out) biases (f32)."""
    B, D = x.shape
    Dp = _round_up(D, 128)            # lane-dense feature dim (128 multiple)
    if tb is None:
        tb = _pick_batch_tile(B)
    Bp = _round_up(B, tb)
    grid = (Bp // tb,)

    w1 = params["w1"].astype(compute_dtype)
    w2 = params["w2"].astype(compute_dtype)
    w3 = params["w3"].astype(compute_dtype)
    w4 = params["w4"].astype(compute_dtype)
    b1, b2, b3, b4 = params["b1"], params["b2"], params["b3"], params["b4"]

    # Host-side zero padding: padded x columns meet zero w1 rows (no effect),
    # padded w4 columns / b4 entries produce zero output columns (sliced off).
    if Dp != D:
        w1 = jnp.pad(w1, ((0, Dp - D), (0, 0)))
        w4 = jnp.pad(w4, ((0, 0), (0, Dp - D)))
        b4 = jnp.pad(b4, ((0, 0), (0, Dp - D)))
    xp = x
    if (Bp, Dp) != (B, D):
        xp = jnp.pad(x, ((0, Bp - B), (0, Dp - D)))

    def resident(arr):
        # Full-array block, constant index_map -> stays in VMEM across steps.
        return pl.BlockSpec(arr.shape, lambda i: (0, 0))

    flops = 2 * Bp * (2 * Dp * HIDDEN + 2 * HIDDEN * HIDDEN)
    bytes_accessed = (
        xp.size * xp.dtype.itemsize            # read x
        + Bp * Dp * x.dtype.itemsize           # write out
        + sum(a.size * a.dtype.itemsize
              for a in (w1, w2, w3, w4, b1, b2, b3, b4)))

    out = pl.pallas_call(
        ae_kernel,
        out_shape=jax.ShapeDtypeStruct((Bp, Dp), x.dtype),
        grid_spec=pl.GridSpec(
            grid=grid,
            in_specs=[
                pl.BlockSpec((tb, Dp), lambda i: (i, 0)),   # x batch tile
                resident(w1), resident(b1),
                resident(w2), resident(b2),
                resident(w3), resident(b3),
                resident(w4), resident(b4),
            ],
            out_specs=pl.BlockSpec((tb, Dp), lambda i: (i, 0)),
        ),
        compiler_params=pltpu.CompilerParams(
            dimension_semantics=("parallel",)),
        cost_estimate=pl.CostEstimate(
            flops=flops, transcendentals=0, bytes_accessed=bytes_accessed),
    )(xp, w1, b1, w2, b2, w3, b3, w4, b4)

    if (Bp, Dp) != (B, D):
        out = out[:B, :D]
    return out


def init_params(key, input_shape):
    """nn.Linear-style U(-1/sqrt(fan_in), 1/sqrt(fan_in)) init.
    Weights stored transposed: (in_features, out_features)."""
    dims = [(input_shape, HIDDEN), (HIDDEN, HIDDEN),
            (HIDDEN, HIDDEN), (HIDDEN, input_shape)]
    params = {}
    keys = jax.random.split(key, 2 * len(dims))
    for idx, (fan_in, fan_out) in enumerate(dims):
        bound = 1.0 / jnp.sqrt(fan_in)
        params[f"w{idx + 1}"] = jax.random.uniform(
            keys[2 * idx], (fan_in, fan_out), jnp.float32, -bound, bound)
        params[f"b{idx + 1}"] = jax.random.uniform(
            keys[2 * idx + 1], (1, fan_out), jnp.float32, -bound, bound)
    return params


def ae_reference(x, params, compute_dtype=jnp.float32):
    h = x
    for i in range(1, 5):
        w = params[f"w{i}"].astype(compute_dtype)
        h = jnp.dot(h.astype(compute_dtype), w,
                    preferred_element_type=jnp.float32)
        h = jnp.maximum(h + params[f"b{i}"], 0.0)
    return h


if __name__ == "__main__":
    key = jax.random.PRNGKey(0)
    k_param, k_x = jax.random.split(key)

    B, D = 16, 256  # small synthetic shapes: batch=16, input_shape=256
    params = init_params(k_param, D)
    x = jax.random.normal(k_x, (B, D), jnp.float32)

    # Default (perf) path: bf16 matmul operands, f32 accumulation.
    out_bf16 = jax.block_until_ready(ae_forward(x, params))
    ref_bf16 = ae_reference(x, params, jnp.bfloat16)
    ref_f32 = ae_reference(x, params, jnp.float32)
    assert out_bf16.shape == (B, D)
    assert jnp.allclose(out_bf16, ref_bf16, atol=1e-3, rtol=1e-3), \
        "bf16 kernel mismatch vs bf16 JAX reference"
    assert jnp.allclose(out_bf16, ref_f32, atol=5e-2, rtol=5e-2), \
        "bf16 kernel drifted too far from f32 reference"

    # Full-precision path (exact original-module semantics).
    out_f32 = jax.block_until_ready(
        ae_forward(x, params, compute_dtype=jnp.float32))
    assert jnp.allclose(out_f32, ref_f32, atol=1e-5, rtol=1e-5), \
        "f32 kernel mismatch vs f32 JAX reference"

    print("KERNEL_OK")
</pallas_src>

<mosaic_0001>
module attributes {stable_mosaic.version = 11 : i64} {
  func.func @ae_kernel(%arg0: i32, %arg1: memref<16x256xf32, #tpu.memory_space<vmem>>, %arg2: memref<256x128xbf16, #tpu.memory_space<vmem>>, %arg3: memref<1x128xf32, #tpu.memory_space<vmem>>, %arg4: memref<128x128xbf16, #tpu.memory_space<vmem>>, %arg5: memref<1x128xf32, #tpu.memory_space<vmem>>, %arg6: memref<128x128xbf16, #tpu.memory_space<vmem>>, %arg7: memref<1x128xf32, #tpu.memory_space<vmem>>, %arg8: memref<128x256xbf16, #tpu.memory_space<vmem>>, %arg9: memref<1x256xf32, #tpu.memory_space<vmem>>, %arg10: memref<16x256xf32, #tpu.memory_space<vmem>>) attributes {dimension_semantics = [#tpu.dimension_semantics<parallel>], iteration_bounds = array<i64: 1>, scalar_prefetch = 0 : i64, scratch_operands = 0 : i64, tpu.core_type = #tpu.core_type<tc>, window_params = [{transform_indices = @transform_0, window_bounds = array<i64: 16, 256>}, {pipeline_mode = #tpu.pipeline_mode<synchronous>, transform_indices = @transform_1, window_bounds = array<i64: 256, 128>}, {pipeline_mode = #tpu.pipeline_mode<synchronous>, transform_indices = @transform_2, window_bounds = array<i64: 1, 128>}, {pipeline_mode = #tpu.pipeline_mode<synchronous>, transform_indices = @transform_3, window_bounds = array<i64: 128, 128>}, {pipeline_mode = #tpu.pipeline_mode<synchronous>, transform_indices = @transform_4, window_bounds = array<i64: 1, 128>}, {pipeline_mode = #tpu.pipeline_mode<synchronous>, transform_indices = @transform_5, window_bounds = array<i64: 128, 128>}, {pipeline_mode = #tpu.pipeline_mode<synchronous>, transform_indices = @transform_6, window_bounds = array<i64: 1, 128>}, {pipeline_mode = #tpu.pipeline_mode<synchronous>, transform_indices = @transform_7, window_bounds = array<i64: 128, 256>}, {pipeline_mode = #tpu.pipeline_mode<synchronous>, transform_indices = @transform_8, window_bounds = array<i64: 1, 256>}, {transform_indices = @transform_9, window_bounds = array<i64: 16, 256>}]} {
    %c0 = arith.constant 0 : index
    %c0_0 = arith.constant 0 : index
    %0 = vector.load %arg1[%c0, %c0_0] : memref<16x256xf32, #tpu.memory_space<vmem>>, vector<16x256xf32>
    %1 = arith.truncf %0 : vector<16x256xf32> to vector<16x256xbf16>
    %c0_1 = arith.constant 0 : index
    %c0_2 = arith.constant 0 : index
    %2 = vector.load %arg2[%c0_1, %c0_2] : memref<256x128xbf16, #tpu.memory_space<vmem>>, vector<256x128xbf16>
    %cst = arith.constant dense<0.000000e+00> : vector<16x128xf32>
    %3 = tpu.matmul %1, %2, %cst {dimension_numbers = #tpu.dot_dimension_numbers<[1], [0], [0], [1], [0, 0, 1, 1], [], []>} : vector<16x256xbf16>, vector<256x128xbf16>, vector<16x128xf32> -> vector<16x128xf32>
    %c0_3 = arith.constant 0 : index
    %c0_4 = arith.constant 0 : index
    %4 = vector.load %arg3[%c0_3, %c0_4] : memref<1x128xf32, #tpu.memory_space<vmem>>, vector<1x128xf32>
    %5 = vector.broadcast %4 : vector<1x128xf32> to vector<16x128xf32>
    %6 = arith.addf %3, %5 : vector<16x128xf32>
    %cst_5 = arith.constant 0.000000e+00 : f32
    %7 = vector.broadcast %cst_5 : f32 to vector<16x128xf32>
    %8 = arith.maximumf %6, %7 : vector<16x128xf32>
    %9 = arith.truncf %8 : vector<16x128xf32> to vector<16x128xbf16>
    %c0_6 = arith.constant 0 : index
    %c0_7 = arith.constant 0 : index
    %10 = vector.load %arg4[%c0_6, %c0_7] : memref<128x128xbf16, #tpu.memory_space<vmem>>, vector<128x128xbf16>
    %cst_8 = arith.constant dense<0.000000e+00> : vector<16x128xf32>
    %11 = tpu.matmul %9, %10, %cst_8 {dimension_numbers = #tpu.dot_dimension_numbers<[1], [0], [0], [1], [0, 0, 1, 1], [], []>} : vector<16x128xbf16>, vector<128x128xbf16>, vector<16x128xf32> -> vector<16x128xf32>
    %c0_9 = arith.constant 0 : index
    %c0_10 = arith.constant 0 : index
    %12 = vector.load %arg5[%c0_9, %c0_10] : memref<1x128xf32, #tpu.memory_space<vmem>>, vector<1x128xf32>
    %13 = vector.broadcast %12 : vector<1x128xf32> to vector<16x128xf32>
    %14 = arith.addf %11, %13 : vector<16x128xf32>
    %cst_11 = arith.constant 0.000000e+00 : f32
    %15 = vector.broadcast %cst_11 : f32 to vector<16x128xf32>
    %16 = arith.maximumf %14, %15 : vector<16x128xf32>
    %17 = arith.truncf %16 : vector<16x128xf32> to vector<16x128xbf16>
    %c0_12 = arith.constant 0 : index
    %c0_13 = arith.constant 0 : index
    %18 = vector.load %arg6[%c0_12, %c0_13] : memref<128x128xbf16, #tpu.memory_space<vmem>>, vector<128x128xbf16>
    %cst_14 = arith.constant dense<0.000000e+00> : vector<16x128xf32>
    %19 = tpu.matmul %17, %18, %cst_14 {dimension_numbers = #tpu.dot_dimension_numbers<[1], [0], [0], [1], [0, 0, 1, 1], [], []>} : vector<16x128xbf16>, vector<128x128xbf16>, vector<16x128xf32> -> vector<16x128xf32>
    %c0_15 = arith.constant 0 : index
    %c0_16 = arith.constant 0 : index
    %20 = vector.load %arg7[%c0_15, %c0_16] : memref<1x128xf32, #tpu.memory_space<vmem>>, vector<1x128xf32>
    %21 = vector.broadcast %20 : vector<1x128xf32> to vector<16x128xf32>
    %22 = arith.addf %19, %21 : vector<16x128xf32>
    %cst_17 = arith.constant 0.000000e+00 : f32
    %23 = vector.broadcast %cst_17 : f32 to vector<16x128xf32>
    %24 = arith.maximumf %22, %23 : vector<16x128xf32>
    %25 = arith.truncf %24 : vector<16x128xf32> to vector<16x128xbf16>
    %c0_18 = arith.constant 0 : index
    %c0_19 = arith.constant 0 : index
    %26 = vector.load %arg8[%c0_18, %c0_19] : memref<128x256xbf16, #tpu.memory_space<vmem>>, vector<128x256xbf16>
    %cst_20 = arith.constant dense<0.000000e+00> : vector<16x256xf32>
    %27 = tpu.matmul %25, %26, %cst_20 {dimension_numbers = #tpu.dot_dimension_numbers<[1], [0], [0], [1], [0, 0, 1, 1], [], []>} : vector<16x128xbf16>, vector<128x256xbf16>, vector<16x256xf32> -> vector<16x256xf32>
    %c0_21 = arith.constant 0 : index
    %c0_22 = arith.constant 0 : index
    %28 = vector.load %arg9[%c0_21, %c0_22] : memref<1x256xf32, #tpu.memory_space<vmem>>, vector<1x256xf32>
    %29 = vector.broadcast %28 : vector<1x256xf32> to vector<16x256xf32>
    %30 = arith.addf %27, %29 : vector<16x256xf32>
    %cst_23 = arith.constant 0.000000e+00 : f32
    %31 = vector.broadcast %cst_23 : f32 to vector<16x256xf32>
    %32 = arith.maximumf %30, %31 : vector<16x256xf32>
    %c0_24 = arith.constant 0 : index
    %c0_25 = arith.constant 0 : index
    %33 = vector.load %arg10[%c0_24, %c0_25] : memref<16x256xf32, #tpu.memory_space<vmem>>, vector<16x256xf32>
    tpu.vector_store %arg10[%c0_24, %c0_25], %32 {strides = array<i32>} : memref<16x256xf32, #tpu.memory_space<vmem>>, vector<16x256xf32>,
    return
  }
  func.func @transform_0(%arg0: i32) -> (i32, i32) {
    %c0_i32 = arith.constant 0 : i32
    %c0_i32_0 = arith.constant 0 : i32
    return %arg0, %c0_i32 : i32, i32
  }
  func.func @transform_1(%arg0: i32) -> (i32, i32) {
    %c0_i32 = arith.constant 0 : i32
    %c0_i32_0 = arith.constant 0 : i32
    %c0_i32_1 = arith.constant 0 : i32
    return %c0_i32, %c0_i32_0 : i32, i32
  }
  func.func @transform_2(%arg0: i32) -> (i32, i32) {
    %c0_i32 = arith.constant 0 : i32
    %c0_i32_0 = arith.constant 0 : i32
    %c0_i32_1 = arith.constant 0 : i32
    return %c0_i32, %c0_i32_0 : i32, i32
  }
  func.func @transform_3(%arg0: i32) -> (i32, i32) {
    %c0_i32 = arith.constant 0 : i32
    %c0_i32_0 = arith.constant 0 : i32
    %c0_i32_1 = arith.constant 0 : i32
    return %c0_i32, %c0_i32_0 : i32, i32
  }
  func.func @transform_4(%arg0: i32) -> (i32, i32) {
    %c0_i32 = arith.constant 0 : i32
    %c0_i32_0 = arith.constant 0 : i32
    %c0_i32_1 = arith.constant 0 : i32
    return %c0_i32, %c0_i32_0 : i32, i32
  }
  func.func @transform_5(%arg0: i32) -> (i32, i32) {
    %c0_i32 = arith.constant 0 : i32
    %c0_i32_0 = arith.constant 0 : i32
    %c0_i32_1 = arith.constant 0 : i32
    return %c0_i32, %c0_i32_0 : i32, i32
  }
  func.func @transform_6(%arg0: i32) -> (i32, i32) {
    %c0_i32 = arith.constant 0 : i32
    %c0_i32_0 = arith.constant 0 : i32
    %c0_i32_1 = arith.constant 0 : i32
    return %c0_i32, %c0_i32_0 : i32, i32
  }
  func.func @transform_7(%arg0: i32) -> (i32, i32) {
    %c0_i32 = arith.constant 0 : i32
    %c0_i32_0 = arith.constant 0 : i32
    %c0_i32_1 = arith.constant 0 : i32
    return %c0_i32, %c0_i32_0 : i32, i32
  }
  func.func @transform_8(%arg0: i32) -> (i32, i32) {
    %c0_i32 = arith.constant 0 : i32
    %c0_i32_0 = arith.constant 0 : i32
    %c0_i32_1 = arith.constant 0 : i32
    return %c0_i32, %c0_i32_0 : i32, i32
  }
  func.func @transform_9(%arg0: i32) -> (i32, i32) {
    %c0_i32 = arith.constant 0 : i32
    %c0_i32_0 = arith.constant 0 : i32
    return %arg0, %c0_i32 : i32, i32
  }
}

</mosaic_0001>

<bundles_post_ra>
// kernel: tpu_custom_call.1
= control target key start
LH: loop header
LB: loop body
LE: loop exit
PB: predicated region body
PF: predicated region fallthrough
CT: control target
= control target key end

     0   :  { %14 = vsyncpa [#allocation3], 0  ;;  %s1219_s0 = inlined_call_operand.hbm [shape: f32[16,256], index: 0, kind: input, shape index: {}]   ;;  %s1220_s1 = inlined_call_operand.hbm [shape: bf16[256,128], index: 1, kind: input, shape index: {}]   ;;  %s1221_s2 = inlined_call_operand.vmem [shape: f32[1,128], index: 2, kind: input, shape index: {}]   ;;  %s1222_s3 = inlined_call_operand.hbm [shape: bf16[128,128], index: 3, kind: input, shape index: {}]   ;;  %s1223_s4 = inlined_call_operand.vmem [shape: f32[1,128], index: 4, kind: input, shape index: {}]   ;;  %s1224_s5 = inlined_call_operand.hbm [shape: bf16[128,128], index: 5, kind: input, shape index: {}]   ;;  %s1225_s6 = inlined_call_operand.vmem [shape: f32[1,128], index: 6, kind: input, shape index: {}]   ;;  %s1226_s7 = inlined_call_operand.hbm [shape: bf16[128,256], index: 7, kind: input, shape index: {}]   ;;  %s1227_s8 = inlined_call_operand.vmem [shape: f32[1,256], index: 8, kind: input, shape index: {}]   ;;  %s1228_s9 = inlined_call_operand.hbm [shape: f32[16,256], index: 9, kind: output, shape index: {}]  }
   0x1   :  { %15 = vsyncpa [#allocation6], 0 }
   0x2   :  { %16 = vsyncpa [#allocation9], 0 }
   0x3   :  { %17 = vsyncpa [#allocation4], 0  ;;  %s1037_s30 = smov [#allocation5]   ;;  %s897_s13 = scalar_lea.hbm %s1220_s1, 2048 }
   0x4   :  { %s35_s10 = sshll.u32 %s1037_s30, 4  ;;  %p898_p0 = scmp.ne.s32.totalorder %s1220_s1, %s897_s13  ;;  %s36_s10 = int_to_ptr.vmem [resolvable:$true] %s35_s10 }
   0x5   :  { %p901_p1 = scmp.lt.u32.totalorder %s897_s13, %s1220_s1 }
   0x7   :  { %p903_p2 = pnand %p901_p1, %p898_p0 }
   0x9   :  { %906 = shalt.err (!%p903_p2)
}
   0xa   :  { %s907_s18 = scalar_lea.vmem %s36_s10, 2048  ;;  %p912_p4 = scmp.lt.s32.totalorder %s36_s10, %s36_s10 }
   0xb   :  { %p908_p3 = scmp.ne.s32.totalorder %s36_s10, %s907_s18  ;;  %p913_p5 = scmp.lt.s32.totalorder %s907_s18, %s907_s18 }
   0xd   :  { %p914_p6 = por %p913_p5, %p912_p4 }
   0xf   :  { %p915_p7 = pnand %p914_p6, %p908_p3 }
  0x11   :  { %918 = shalt.err (!%p915_p7)
}
  0x12   :  { %s1038_s19 = smov 64   ;;  %s1039_s20 = smov 4  }
  0x13   :  { %41 = dma.hbm_to_vmem [thread:$0]  %s1220_s1, 2048, %s36_s10, [#allocation6], %s1038_s19, %s1038_s19, %s1039_s20  }
  0x14   :  { %s1040_s23 = smov [#allocation8]   ;;  %s1041_s25 = smov [#allocation2]  }
  0x15   :  { %s63_s24 = sshll.u32 %s1040_s23, 4  ;;  %s23_s26 = sshll.u32 %s1041_s25, 4  ;;  %s64_s24 = int_to_ptr.vmem [resolvable:$true] %s63_s24  ;;  %s24_s26 = int_to_ptr.vmem [resolvable:$true] %s23_s26 }
  0x16   :  { %s919_s29 = scalar_lea.hbm %s1224_s5, 1024 }
  0x17   :  { %p920_p8 = scmp.ne.s32.totalorder %s1224_s5, %s919_s29  ;;  %p923_p9 = scmp.lt.u32.totalorder %s919_s29, %s1224_s5 }
  0x19   :  { %p925_p10 = pnand %p923_p9, %p920_p8 }
  0x1b   :  { %928 = shalt.err (!%p925_p10)
}
  0x1c   :  { %s929_s1 = scalar_lea.vmem %s64_s24, 1024  ;;  %p934_p12 = scmp.lt.s32.totalorder %s64_s24, %s64_s24 }
  0x1d   :  { %p930_p11 = scmp.ne.s32.totalorder %s64_s24, %s929_s1  ;;  %p935_p13 = scmp.lt.s32.totalorder %s929_s1, %s929_s1 }
  0x1f   :  { %p936_p0 = por %p935_p13, %p934_p12 }
  0x21   :  { %p937_p1 = pnand %p936_p0, %p930_p11 }
  0x23   :  { %940 = shalt.err (!%p937_p1)
}
  0x24   :  { %69 = dma.hbm_to_vmem [thread:$0]  %s1224_s5, 1024, %s64_s24, [#allocation9], %s1038_s19, %s1038_s19, %s1039_s20  }
  0x25   :  { %s941_s17 = scalar_lea.hbm %s1219_s0, 512 }
  0x26   :  { %p942_p2 = scmp.ne.s32.totalorder %s1219_s0, %s941_s17  ;;  %p945_p3 = scmp.lt.u32.totalorder %s941_s17, %s1219_s0 }
  0x28   :  { %p947_p4 = pnand %p945_p3, %p942_p2 }
  0x2a   :  { %950 = shalt.err (!%p947_p4)
}
  0x2b   :  { %s951_s25 = scalar_lea.vmem %s24_s26, 512  ;;  %p956_p6 = scmp.lt.s32.totalorder %s24_s26, %s24_s26 }
  0x2c   :  { %p952_p5 = scmp.ne.s32.totalorder %s24_s26, %s951_s25  ;;  %p957_p7 = scmp.lt.s32.totalorder %s951_s25, %s951_s25 }
  0x2e   :  { %p958_p8 = por %p957_p7, %p956_p6 }
  0x30   :  { %p959_p9 = pnand %p958_p8, %p952_p5 }
  0x32   :  { %962 = shalt.err (!%p959_p9)
}
  0x33   :  { %s1042_s5 = smov 256   ;;  %s1043_s24 = smov 16  }
  0x34   :  { %29 = dma.hbm_to_vmem [thread:$0]  %s1219_s0, 512, %s24_s26, [#allocation3], %s1042_s5, %s1042_s5, %s1043_s24  }
  0x35   :  { %s1044_s29 = smov [#allocation7]   ;;  %s1045_s11 = smov [#allocation10]  }
  0x36   :  { %s49_s30 = sshll.u32 %s1044_s29, 4  ;;  %s77_s12 = sshll.u32 %s1045_s11, 4  ;;  %s50_s30 = int_to_ptr.vmem [resolvable:$true] %s49_s30  ;;  %s78_s12 = int_to_ptr.vmem [resolvable:$true] %s77_s12 }
  0x37   :  { %s963_s10 = scalar_lea.hbm %s1222_s3, 1024 }
  0x38   :  { %p964_p10 = scmp.ne.s32.totalorder %s1222_s3, %s963_s10  ;;  %p967_p11 = scmp.lt.u32.totalorder %s963_s10, %s1222_s3 }
  0x3a   :  { %p969_p12 = pnand %p967_p11, %p964_p10 }
  0x3c   :  { %972 = shalt.err (!%p969_p12)
}
  0x3d   :  { %s973_s0 = scalar_lea.vmem %s50_s30, 1024  ;;  %p978_p0 = scmp.lt.s32.totalorder %s50_s30, %s50_s30 }
  0x3e   :  { %p974_p13 = scmp.ne.s32.totalorder %s50_s30, %s973_s0  ;;  %p979_p1 = scmp.lt.s32.totalorder %s973_s0, %s973_s0 }
  0x40   :  { %p980_p2 = por %p979_p1, %p978_p0 }
  0x42   :  { %p981_p3 = pnand %p980_p2, %p974_p13 }
  0x44   :  { %984 = shalt.err (!%p981_p3)
}
  0x45   :  { %55 = dma.hbm_to_vmem [thread:$0]  %s1222_s3, 1024, %s50_s30, [#allocation6], %s1038_s19, %s1038_s19, %s1039_s20  }
  0x46   :  { %s985_s23 = scalar_lea.hbm %s1226_s7, 2048 }
  0x47   :  { %p986_p4 = scmp.ne.s32.totalorder %s1226_s7, %s985_s23  ;;  %p989_p5 = scmp.lt.u32.totalorder %s985_s23, %s1226_s7 }
  0x49   :  { %p991_p6 = pnand %p989_p5, %p986_p4 }
  0x4b   :  { %994 = shalt.err (!%p991_p6)
}
  0x4c   :  { %s995_s11 = scalar_lea.vmem %s78_s12, 2048  ;;  %p1000_p8 = scmp.lt.s32.totalorder %s78_s12, %s78_s12 }
  0x4d   :  { %p996_p7 = scmp.ne.s32.totalorder %s78_s12, %s995_s11  ;;  %p1001_p9 = scmp.lt.s32.totalorder %s995_s11, %s995_s11 }
  0x4f   :  { %p1002_p10 = por %p1001_p9, %p1000_p8 }
  0x51   :  { %p1003_p11 = pnand %p1002_p10, %p996_p7 }
  0x53   :  { %1006 = shalt.err (!%p1003_p11)
}
  0x54   :  { %s1046_s3 = smov 128   ;;  %s1047_s19 = smov 8  }
  0x55   :  { %83 = dma.hbm_to_vmem [thread:$0]  %s1226_s7, 2048, %s78_s12, [#allocation9], %s1046_s3, %s1046_s3, %s1047_s19  }
  0x56   :  { %1029 = dma.done.wait [#allocation3], 512  }
  0x57   :  { %1030 = vsyncadd [#allocation3], 4294966784 }
  0x58   :  { %1031 = dma.done.wait [#allocation6], 3072  }
  0x59   :  { %1032 = vsyncadd [#allocation6], 4294964224 }
  0x5a   :  { %1033 = dma.done.wait [#allocation9], 3072  }
  0x5b   :  { %1034 = vsyncadd [#allocation9], 4294964224  ;;  %v1048_v0 = vmov 0.0   ;;  %v841_v1 = vld [vmem:[#allocation5 + $0x40] sm:$0xff]   ;;  %v843_v3 = vld [vmem:[#allocation5 + $0x48] sm:$0xff]   ;;  %vm1049_vm0 = vmmov 0  }
  0x5c   :  { %786 = vmatprep.subr.bf16.mxu1 %v1048_v0  ;;  %v842_v2 = vld [vmem:[#allocation5] sm:$0xff]   ;;  %746 = vmatprep.subr.bf16.mxu0 %v841_v1  ;;  %v844_v4 = vld [vmem:[#allocation5 + $0x8] sm:$0xff]   ;;  %v845_v5 = vld [vmem:[#allocation5 + $0x50] sm:$0xff]  }
  0x5d   :  { %747 = vmatpush3.bf16.msra.mxu0 %v842_v2  ;;  %v846_v6 = vld [vmem:[#allocation5 + $0x10] sm:$0xff]   ;;  %v847_v7 = vld [vmem:[#allocation5 + $0x58] sm:$0xff]   ;;  %v849_v9 = vld [vmem:[#allocation5 + $0x60] sm:$0xff]   ;;  %802 = vmatprep.mubr.msk.bf16.mxu1 %vm1049_vm0, %v1048_v0 }
  0x5e   :  { %748 = vmatprep.subr.bf16.mxu0 %v843_v3  ;;  %v848_v8 = vld [vmem:[#allocation5 + $0x18] sm:$0xff]   ;;  %v850_v10 = vld [vmem:[#allocation5 + $0x20] sm:$0xff]   ;;  %v851_v11 = vld [vmem:[#allocation5 + $0x68] sm:$0xff]  }
  0x5f   :  { %v103_v12 = vld [vmem:[#allocation2 + $0x8] sm:$0xff]  ;;  %v105_v13 = vld [vmem:[#allocation2 + $0x18] sm:$0xff]  ;;  %v857_v16 = vld [vmem:[#allocation7] sm:$0xff]  }
  0x60   :  { %v852_v14 = vld [vmem:[#allocation5 + $0x28] sm:$0xff]   ;;  %v107_v15 = vpack.c.bf16 %v105_v13, %v103_v12  ;;  %v853_v17 = vld [vmem:[#allocation5 + $0x70] sm:$0xff]   ;;  %787 = vmatpush3.bf16.msra.mxu1 %v857_v16  ;;  %v855_v20 = vld [vmem:[#allocation5 + $0x78] sm:$0xff]   ;;  %v1050_v13 = vmov 0  }
  0x61   :  { %749 = vmatpush3.bf16.msra.mxu0 %v844_v4  ;;  %v858_v18 = vld [vmem:[#allocation7 + $0x8] sm:$0xff]   ;;  %v854_v19 = vld [vmem:[#allocation5 + $0x30] sm:$0xff]   ;;  %788 = vmatprep.subr.bf16.mxu1 %v1048_v0  ;;  %v856_v22 = vld [vmem:[#allocation5 + $0x38] sm:$0xff]  }
  0x62   :  { %750 = vmatprep.subr.bf16.mxu0 %v845_v5  ;;  %275 = vmatprep.mubr.bf16.mxu0 %v107_v15  ;;  %v859_v21 = vld [vmem:[#allocation7 + $0x10] sm:$0xff]   ;;  %v102_v23 = vld [vmem:[#allocation2] sm:$0xff]  ;;  %v860_v25 = vld [vmem:[#allocation7 + $0x18] sm:$0xff]  }
  0x63   :  { %v104_v24 = vld [vmem:[#allocation2 + $0x10] sm:$0xff]  ;;  %v861_v27 = vld [vmem:[#allocation7 + $0x20] sm:$0xff]   ;;  %v862_v28 = vld [vmem:[#allocation7 + $0x28] sm:$0xff]  }
  0x64   :  { %789 = vmatpush3.bf16.msra.mxu1 %v858_v18  ;;  %v106_v26 = vpack.c.bf16 %v104_v24, %v102_v23  ;;  %v863_v29 = vld [vmem:[#allocation7 + $0x30] sm:$0xff]   ;;  %v864_v30 = vld [vmem:[#allocation7 + $0x38] sm:$0xff]   ;;  %v865_v31 = vld [vmem:[#allocation8] sm:$0xff]   ;;  %v535_v24 = vlaneseq }
  0x65   :  { %751 = vmatpush3.bf16.msra.mxu0 %v846_v6  ;;  %790 = vmatprep.subr.bf16.mxu1 %v1048_v0  ;;  %v866_v32 = vld [vmem:[#allocation8 + $0x8] sm:$0xff]   ;;  %v867_v33 = vld [vmem:[#allocation8 + $0x10] sm:$0xff]   ;;  %v868_v34 = vld [vmem:[#allocation8 + $0x18] sm:$0xff]  }
  0x66   :  { %752 = vmatprep.subr.bf16.mxu0 %v847_v7  ;;  %v869_v35 = vld [vmem:[#allocation8 + $0x20] sm:$0xff]   ;;  %v870_v36 = vld [vmem:[#allocation8 + $0x28] sm:$0xff]   ;;  %v871_v49 = vld [vmem:[#allocation8 + $0x30] sm:$0xff]  }
  0x67   :  { %v695_v38 = vld [vmem:[%s1221_s2] ss:$0 sm:$0xff]  ;;  %v872_v50 = vld [vmem:[#allocation8 + $0x38] sm:$0xff]   ;;  %v875_v52 = vld [vmem:[#allocation10 + $0x4] ss:$8 sps:$4 sm:$0xff]  }
  0x68   :  { %791 = vmatpush3.bf16.msra.mxu1 %v859_v21  ;;  %v873_v51 = vld [vmem:[#allocation10] ss:$8 sps:$4 sm:$0xff]   ;;  %v878_v53 = vld [vmem:[#allocation10 + $0x14] ss:$8 sps:$4 sm:$0xff]   ;;  %v876_v54 = vld [vmem:[#allocation10 + $0x10] ss:$8 sps:$4 sm:$0xff]  }
  0x69   :  { %753 = vmatpush3.bf16.msra.mxu0 %v848_v8  ;;  %792 = vmatprep.subr.bf16.mxu1 %v1048_v0  ;;  %v881_v55 = vld [vmem:[#allocation10 + $0x24] ss:$8 sps:$4 sm:$0xff]   ;;  %v879_v56 = vld [vmem:[#allocation10 + $0x20] ss:$8 sps:$4 sm:$0xff]   ;;  %v884_v57 = vld [vmem:[#allocation10 + $0x34] ss:$8 sps:$4 sm:$0xff]  }
  0x6a   :  { %754 = vmatprep.subr.bf16.mxu0 %v849_v9  ;;  %v882_v58 = vld [vmem:[#allocation10 + $0x30] ss:$8 sps:$4 sm:$0xff]   ;;  %v887_v59 = vld [vmem:[#allocation10 + $0x44] ss:$8 sps:$4 sm:$0xff]   ;;  %v885_v60 = vld [vmem:[#allocation10 + $0x40] ss:$8 sps:$4 sm:$0xff]  }
  0x6b   :  { %v890_v61 = vld [vmem:[#allocation10 + $0x54] ss:$8 sps:$4 sm:$0xff]   ;;  %v888_v62 = vld [vmem:[#allocation10 + $0x50] ss:$8 sps:$4 sm:$0xff]   ;;  %v712_v63 = vld [vmem:[%s1223_s4] ss:$0 sm:$0xff] }
  0x6c   :  { %793 = vmatpush3.bf16.msra.mxu1 %v860_v25  ;;  %v893_v9 = vld [vmem:[#allocation10 + $0x64] ss:$8 sps:$4 sm:$0xff]   ;;  %v894_v12 = vld [vmem:[#allocation10 + $0x70] ss:$8 sps:$4 sm:$0xff]   ;;  %v536_v25 = vshrl.u32 %v535_v24, 7 }
  0x6d   :  { %755 = vmatpush3.bf16.msra.mxu0 %v850_v10  ;;  %794 = vmatprep.subr.bf16.mxu1 %v1048_v0  ;;  %v891_v10 = vld [vmem:[#allocation10 + $0x60] ss:$8 sps:$4 sm:$0xff]  }
  0x6e   :  { %756 = vmatprep.subr.bf16.mxu0 %v851_v11  ;;  %v896_v11 = vld [vmem:[#allocation10 + $0x74] ss:$8 sps:$4 sm:$0xff]  }
  0x70   :  { %795 = vmatpush3.bf16.msra.mxu1 %v861_v27  ;;  %v533_v27 = vld [vmem:[%s1227_s8] sm:$0x3] }
  0x71   :  { %757 = vmatpush3.bf16.msra.mxu0 %v852_v14  ;;  %796 = vmatprep.subr.bf16.mxu1 %v1048_v0  ;;  %v721_v14 = vld [vmem:[%s1225_s6] ss:$0 sm:$0xff]  ;;  %s1051_s6 = smov [#allocation11]  }
  0x72   :  { %758 = vmatprep.subr.bf16.mxu0 %v853_v17  ;;  %s681_s15 = sshll.u32 %s1051_s6, 4  ;;  %s682_s15 = int_to_ptr.vmem [resolvable:$true] %s681_s15 }
  0x73   :  { %s1007_s8 = scalar_lea.vmem %s682_s15, 512  ;;  %p1012_p13 = scmp.lt.s32.totalorder %s682_s15, %s682_s15 }
  0x74   :  { %797 = vmatpush3.bf16.msra.mxu1 %v862_v28  ;;  %v541_v28 = vsub.s32 1, %v536_v25  ;;  %p1008_p12 = scmp.ne.s32.totalorder %s682_s15, %s1007_s8  ;;  %p1013_p0 = scmp.lt.s32.totalorder %s1007_s8, %s1007_s8 }
  0x75   :  { %759 = vmatpush3.bf16.msra.mxu0 %v854_v19  ;;  %798 = vmatprep.subr.bf16.mxu1 %v1048_v0 }
  0x76   :  { %760 = vmatprep.subr.bf16.mxu0 %v855_v20  ;;  %p1014_p1 = por %p1013_p0, %p1012_p13 }
  0x78   :  { %799 = vmatpush3.bf16.msra.mxu1 %v863_v29  ;;  %p1015_p2 = pnand %p1014_p1, %p1008_p12 }
  0x79   :  { %761 = vmatpush3.bf16.msra.mxu0 %v856_v22  ;;  %800 = vmatprep.subr.bf16.mxu1 %v1048_v0 }
  0x7a   :  { %806 = vmatprep.subr.bf16.mxu0 %v1048_v0 }
  0x7c   :  { %276 = vmatmul.mubr.bf16.vlgmr.msra.gmra.mrb[0].mxu0 %v106_v26  ;;  %801 = vmatpush3.bf16.msra.mxu1 %v864_v30  ;;  %v537_v26 = vsub.s32 0, %v536_v25  ;;  %v542_v30 = vrot.slane %v533_v27, %v541_v28 }
  0x7d   :  { %822 = vmatprep.mubr.msk.bf16.mxu0 %vm1049_vm0, %v1048_v0  ;;  %807 = vmatpush3.bf16.msra.mxu0 %v865_v31 }
  0x7e   :  { %808 = vmatprep.subr.bf16.mxu0 %v1048_v0  ;;  %625 = vmatprep.subr.bf16.mxu1 %v875_v52  ;;  %v538_v29 = vrot.slane %v533_v27, %v537_v26 }
  0x81   :  { %809 = vmatpush3.bf16.msra.mxu0 %v866_v32 }
  0x82   :  { %810 = vmatprep.subr.bf16.mxu0 %v1048_v0 }
  0x85   :  { %811 = vmatpush3.bf16.msra.mxu0 %v867_v33 }
  0x86   :  { %812 = vmatprep.subr.bf16.mxu0 %v1048_v0 }
  0x89   :  { %813 = vmatpush3.bf16.msra.mxu0 %v868_v34 }
  0x8a   :  { %814 = vmatprep.subr.bf16.mxu0 %v1048_v0 }
  0x8d   :  { %815 = vmatpush3.bf16.msra.mxu0 %v869_v35 }
  0x8e   :  { %816 = vmatprep.subr.bf16.mxu0 %v1048_v0 }
  0x91   :  { %817 = vmatpush3.bf16.msra.mxu0 %v870_v36 }
  0x92   :  { %818 = vmatprep.subr.bf16.mxu0 %v1048_v0 }
  0x95   :  { %819 = vmatpush3.bf16.msra.mxu0 %v871_v49 }
  0x96   :  { %820 = vmatprep.subr.bf16.mxu0 %v1048_v0 }
  0x99   :  { %821 = vmatpush3.bf16.msra.mxu0 %v872_v50 }
 0x14f   :  { %v762_v37 = vpop.f32.mrb[0].mxu0 }
 0x150   :  { %v763_v39 = vpop.f32.mrb[1].mxu0 }
 0x151   :  { %v764_v40 = vadd.f32 %v763_v39, %v762_v37  ;;  %v765_v41 = vpop.f32.mrb[2].mxu0 }
 0x152   :  { %v766_v42 = vpop.f32.mrb[3].mxu0 }
 0x153   :  { %v278_v43 = vadd.f32 %v764_v40, %v695_v38  ;;  %v767_v44 = vadd.f32 %v766_v42, %v765_v41 }
 0x155   :  { %v281_v45 = vadd.f32 %v767_v44, %v695_v38  ;;  %v284_v46 = vmax.f32 %v278_v43, 0.0 }
 0x157   :  { %v285_v47 = vmax.f32 %v281_v45, 0.0 }
 0x159   :  { %v286_v48 = vpack.c.bf16 %v285_v47, %v284_v46 }
 0x15b   :  { %803 = vmatmul.mubr.bf16.vlgmr.msra.gmra.mrb[0].mxu1 %v286_v48 }
 0x15c   :  { %626 = vmatpush1.bf16.msra.mxu1 %v873_v51  ;;  %657 = vmatprep.mubr.bf16.mxu1 %v1050_v13 }
 0x15d   :  { %627 = vmatprep.subr.bf16.mxu1 %v878_v53 }
 0x160   :  { %628 = vmatpush1.bf16.msra.mxu1 %v876_v54 }
 0x161   :  { %629 = vmatprep.subr.bf16.mxu1 %v881_v55 }
 0x164   :  { %630 = vmatpush1.bf16.msra.mxu1 %v879_v56 }
 0x165   :  { %631 = vmatprep.subr.bf16.mxu1 %v884_v57 }
 0x168   :  { %632 = vmatpush1.bf16.msra.mxu1 %v882_v58 }
 0x169   :  { %633 = vmatprep.subr.bf16.mxu1 %v887_v59 }
 0x16c   :  { %634 = vmatpush1.bf16.msra.mxu1 %v885_v60 }
 0x16d   :  { %635 = vmatprep.subr.bf16.mxu1 %v890_v61 }
 0x170   :  { %636 = vmatpush1.bf16.msra.mxu1 %v888_v62 }
 0x171   :  { %637 = vmatprep.subr.bf16.mxu1 %v893_v9 }
 0x174   :  { %638 = vmatpush1.bf16.msra.mxu1 %v891_v10 }
 0x175   :  { %639 = vmatprep.subr.bf16.mxu1 %v896_v11 }
 0x178   :  { %640 = vmatpush1.bf16.msra.mxu1 %v894_v12 }
 0x22e   :  { %v392_v0 = vpop.f32.mrb[0].mxu1 }
 0x22f   :  { %v393_v1 = vadd.f32 %v712_v63, %v392_v0  ;;  %v804_v2 = vpop.f32.mrb[1].mxu1 }
 0x230   :  { %v395_v3 = vpop.f32.mrb[2].mxu1 }
 0x231   :  { %v396_v4 = vadd.f32 %v712_v63, %v395_v3  ;;  %v805_v5 = vpop.f32.mrb[3].mxu1  ;;  %v399_v6 = vmax.f32 %v393_v1, 0.0 }
 0x233   :  { %v400_v7 = vmax.f32 %v396_v4, 0.0 }
 0x235   :  { %v401_v8 = vpack.c.bf16 %v400_v7, %v399_v6 }
 0x237   :  { %823 = vmatmul.mubr.bf16.vlgmr.msra.gmra.mrb[4].mxu0 %v401_v8 }
 0x30a   :  { %v507_v15 = vpop.f32.mrb[4].mxu0 }
 0x30b   :  { %v508_v16 = vadd.f32 %v721_v14, %v507_v15  ;;  %v824_v17 = vpop.f32.mrb[5].mxu0 }
 0x30c   :  { %v510_v18 = vpop.f32.mrb[6].mxu0 }
 0x30d   :  { %v511_v19 = vadd.f32 %v721_v14, %v510_v18  ;;  %v825_v20 = vpop.f32.mrb[7].mxu0  ;;  %v514_v21 = vmax.f32 %v508_v16, 0.0 }
 0x30f   :  { %v515_v22 = vmax.f32 %v511_v19, 0.0 }
 0x311   :  { %v516_v23 = vpack.c.bf16 %v515_v22, %v514_v21 }
 0x313   :  { %658 = vmatmul.mubr.bf16.vlgmr.msra.gmra.mrb[4].mxu1 %v516_v23 }
 0x3e6   :  { %v659_v31 = vpop.f32.mrb[4].mxu1 }
 0x3e7   :  { %v660_v32 = vadd.f32 %v659_v31, %v538_v29  ;;  %v661_v33 = vpop.f32.mrb[5].mxu1 }
 0x3e8   :  { %v662_v34 = vadd.f32 %v661_v33, %v542_v30  ;;  %v663_v35 = vpop.f32.mrb[6].mxu1 }
 0x3e9   :  { %v668_v36 = vmax.f32 %v660_v32, 0.0  ;;  %v664_v37 = vadd.f32 %v663_v35, %v538_v29  ;;  %v665_v38 = vpop.f32.mrb[7].mxu1 }
 0x3ea   :  { %v669_v39 = vmax.f32 %v662_v34, 0.0  ;;  %v666_v40 = vadd.f32 %v665_v38, %v542_v30 }
 0x3eb   :  { %672 = vst [vmem:[#allocation11] sm:$0xff] %v668_v36  ;;  %v670_v41 = vmax.f32 %v664_v37, 0.0 }
 0x3ec   :  { %673 = vst [vmem:[#allocation11 + $0x8] sm:$0xff] %v669_v39  ;;  %v671_v42 = vmax.f32 %v666_v40, 0.0 }
 0x3ed   :  { %674 = vst [vmem:[#allocation11 + $0x10] sm:$0xff] %v670_v41 }
 0x3ee   :  { %675 = vst [vmem:[#allocation11 + $0x18] sm:$0xff] %v671_v42 }
 0x3ef   :  { %1018 = shalt.err (!%p1015_p2)
}
 0x3f0   :  { %s1019_s0 = scalar_lea.hbm %s1228_s9, 512 }
 0x3f1   :  { %p1020_p3 = scmp.ne.s32.totalorder %s1228_s9, %s1019_s0  ;;  %p1023_p4 = scmp.lt.u32.totalorder %s1019_s0, %s1228_s9 }
 0x3f3   :  { %p1025_p5 = pnand %p1023_p4, %p1020_p3 }
 0x3f5   :  { %1028 = shalt.err (!%p1025_p5)
}
 0x3f6   :  { %687 = dma.vmem_to_hbm [thread:$0]  %s682_s15, 512, %s1228_s9, [#allocation4], %s1042_s5, %s1042_s5, %s1043_s24  }
 0x3f7   :  { %1035 = dma.done.wait [#allocation4], 512  }
 0x3f8   :  { %1036 = vsyncadd [#allocation4], 4294966784 }
 0x3f9   :  { %691 = vsyncpa [#allocation3], 1 }
 0x3fa   :  { %692 = vsyncpa [#allocation6], 1 }
 0x3fb   :  { %693 = vsyncpa [#allocation9], 1 }
 0x3fc   :  { %694 = vsyncpa [#allocation4], 1 }

</bundles_post_ra>
